<compile_context>
chip_gen: v7x
topology: tpu7x:2x2x1
jax: 0.10.0
libtpu: 0.0.40
codegen_flags: <defaults>
</compile_context>

<pallas_src>
import functools

import jax
import jax.numpy as jnp
from jax.experimental import pallas as pl
from jax.experimental.pallas import tpu as pltpu


def _build_embedding(dim: int, max_len: int) -> jnp.ndarray:
    """Deterministic sinusoidal table, matching the PyTorch __init__ exactly."""
    assert dim % 2 == 0, "TimeToArrival requires an even `dim` (interleaved sin/cos)."
    pos = jnp.arange(0, max_len, dtype=jnp.float32)[:, None]              # (max_len, 1)
    div_term = 1.0 / jnp.power(
        10000.0, jnp.arange(0, dim, 2, dtype=jnp.float32) / float(dim)
    )                                                                      # (dim//2,)
    angles = pos * div_term                                                # (max_len, dim//2)
    emb = jnp.empty((max_len, dim), dtype=jnp.float32)
    emb = emb.at[:, 0::2].set(jnp.sin(angles))
    emb = emb.at[:, 1::2].set(jnp.cos(angles))
    emb = emb.at[-5:].set(emb[-5])                                         # embedding[-5:] = embedding[-5]
    return emb


def _tta_kernel(x_ref, emb_ref, o_ref):
    # x_ref:   (tile_rows, L) block of the flattened input
    # emb_ref: (1, L) pre-tiled embedding slab (already in x.dtype)
    # Pure VPU broadcast-add; explicit cast on store.
    o_ref[...] = (x_ref[...] + emb_ref[...]).astype(o_ref.dtype)


@functools.partial(jax.jit, static_argnames=("tile_rows",))
def _tta_pallas(x2d, emb_slab, tile_rows):
    R, L = x2d.shape
    grid = (pl.cdiv(R, tile_rows),)
    grid_spec = pltpu.PrefetchScalarGridSpec(
        num_scalar_prefetch=0,
        grid=grid,
        in_specs=[
            pl.BlockSpec((tile_rows, L), lambda r: (r, 0)),
            pl.BlockSpec((1, L), lambda r: (0, 0)),
        ],
        out_specs=pl.BlockSpec((tile_rows, L), lambda r: (r, 0)),
    )
    return pl.pallas_call(
        _tta_kernel,
        out_shape=jax.ShapeDtypeStruct((R, L), x2d.dtype),
        grid_spec=grid_spec,
        compiler_params=pltpu.CompilerParams(
            dimension_semantics=("parallel",),
        ),
        input_output_aliases={0: 0},  # add in place on x's buffer when possible
    )(x2d, emb_slab)


class TimeToArrivalPallas:
    def __init__(self, dim: int, max_len: int):
        self.dim = dim
        self.max_len = max_len
        self.embedding = _build_embedding(dim, max_len)  # (max_len, dim) float32

    def __call__(self, x: jnp.ndarray, tta: int) -> jnp.ndarray:
        D = self.dim
        assert x.shape[-1] == D, f"last dim of x must be {D}, got {x.shape}"

        # Host-side index math (tta is a Python int, as in the PyTorch forward).
        tta_clamped = min(int(tta), self.max_len - 1)
        row_idx = (tta_clamped - 1) % self.max_len   # wrap like PyTorch negative indexing
        row = self.embedding[row_idx]                # (D,) float32

        orig_shape = x.shape
        total = x.size

        if 128 % D == 0 and total % 128 == 0:
            # Lane-dense packed view: collapse everything into 128-wide lanes and
            # pre-tile the embedding row so the broadcast still lines up.
            rep = 128 // D
            slab = jnp.tile(row, rep).astype(x.dtype)[None, :]   # (1, 128)
            x2d = x.reshape(total // 128, 128)
        else:
            # Fallback: rows of length D (lane-dense when D is a multiple of 128).
            slab = row.astype(x.dtype)[None, :]                  # (1, D)
            x2d = x.reshape(-1, D)

        R, L = x2d.shape
        # Tile choice: big enough to amortize per-step overhead, small enough to
        # keep (in + out) x 2 double-buffers comfortably inside v7x's VMEM budget.
        bytes_per_row = L * jnp.dtype(x2d.dtype).itemsize
        max_rows_by_vmem = max(8, (2 * 1024 * 1024) // bytes_per_row)  # ~2 MiB/buffer
        tile_rows = min(R, 1024, max_rows_by_vmem)
        if tile_rows != R:
            tile_rows = max(8, (tile_rows // 8) * 8)  # keep sublane dim a multiple of 8

        out2d = _tta_pallas(x2d, slab, int(tile_rows))
        return out2d.reshape(orig_shape)


if __name__ == "__main__":
    dim = 32
    max_len = 16
    B, S = 2, 8

    key = jax.random.PRNGKey(0)
    x = jax.random.normal(key, (B, S, dim), dtype=jnp.float32)

    module = TimeToArrivalPallas(dim, max_len)

    # Case 1: ordinary tta.
    tta = 7
    out = jax.block_until_ready(module(x, tta))
    ref = x + module.embedding[(min(tta, max_len - 1) - 1) % max_len]
    assert out.shape == (B, S, dim)
    assert jnp.allclose(out, ref, atol=1e-6), "mismatch vs reference (tta=7)"

    # Case 2: tta = 0 exercises PyTorch's negative-index wraparound (embedding[-1]).
    out0 = jax.block_until_ready(module(x, 0))
    ref0 = x + module.embedding[-1]
    assert jnp.allclose(out0, ref0, atol=1e-6), "mismatch vs reference (tta=0)"

    print("KERNEL_OK")
</pallas_src>

<mosaic_0001>
module attributes {stable_mosaic.version = 11 : i64} {
  func.func @_tta_kernel(%arg0: i32, %arg1: memref<4x128xf32, #tpu.memory_space<vmem>>, %arg2: memref<1x128xf32, #tpu.memory_space<vmem>>, %arg3: memref<4x128xf32, #tpu.memory_space<vmem>>) attributes {dimension_semantics = [#tpu.dimension_semantics<parallel>], iteration_bounds = array<i64: 1>, scalar_prefetch = 0 : i64, scratch_operands = 0 : i64, tpu.core_type = #tpu.core_type<tc>, window_params = [{transform_indices = @transform_0, window_bounds = array<i64: 4, 128>}, {pipeline_mode = #tpu.pipeline_mode<synchronous>, transform_indices = @transform_1, window_bounds = array<i64: 1, 128>}, {transform_indices = @transform_2, window_bounds = array<i64: 4, 128>}]} {
    %c0 = arith.constant 0 : index
    %c0_0 = arith.constant 0 : index
    %0 = vector.load %arg1[%c0, %c0_0] : memref<4x128xf32, #tpu.memory_space<vmem>>, vector<4x128xf32>
    %c0_1 = arith.constant 0 : index
    %c0_2 = arith.constant 0 : index
    %1 = vector.load %arg2[%c0_1, %c0_2] : memref<1x128xf32, #tpu.memory_space<vmem>>, vector<1x128xf32>
    %2 = vector.broadcast %1 : vector<1x128xf32> to vector<4x128xf32>
    %3 = arith.addf %0, %2 : vector<4x128xf32>
    %c0_3 = arith.constant 0 : index
    %c0_4 = arith.constant 0 : index
    %4 = vector.load %arg3[%c0_3, %c0_4] : memref<4x128xf32, #tpu.memory_space<vmem>>, vector<4x128xf32>
    tpu.vector_store %arg3[%c0_3, %c0_4], %3 {strides = array<i32>} : memref<4x128xf32, #tpu.memory_space<vmem>>, vector<4x128xf32>,
    return
  }
  func.func @transform_0(%arg0: i32) -> (i32, i32) {
    %c0_i32 = arith.constant 0 : i32
    %c0_i32_0 = arith.constant 0 : i32
    return %arg0, %c0_i32 : i32, i32
  }
  func.func @transform_1(%arg0: i32) -> (i32, i32) {
    %c0_i32 = arith.constant 0 : i32
    %c0_i32_0 = arith.constant 0 : i32
    %c0_i32_1 = arith.constant 0 : i32
    return %c0_i32, %c0_i32_0 : i32, i32
  }
  func.func @transform_2(%arg0: i32) -> (i32, i32) {
    %c0_i32 = arith.constant 0 : i32
    %c0_i32_0 = arith.constant 0 : i32
    return %arg0, %c0_i32 : i32, i32
  }
}

</mosaic_0001>

<bundles_post_ra>
// kernel: _tta_pallas.1
= control target key start
LH: loop header
LB: loop body
LE: loop exit
PB: predicated region body
PF: predicated region fallthrough
CT: control target
= control target key end

     0   :  { %7 = vsyncpa [#allocation3], 0  ;;  %s144_s0 = inlined_call_operand.hbm [shape: f32[4,128], index: 0, kind: input, shape index: {}, may-alias: {0,2}]   ;;  %s145_s1 = inlined_call_operand.vmem [shape: f32[1,128], index: 1, kind: input, shape index: {}]   ;;  %s146_s2 = inlined_call_operand.hbm [shape: f32[4,128], index: 2, kind: output, shape index: {}, may-alias: {0,2}]  }
   0x1   :  { %8 = vsyncpa [#allocation4], 0  ;;  %s100_s9 = smov [#allocation2]   ;;  %s52_s13 = scalar_lea.hbm %s144_s0, 64 }
   0x2   :  { %s15_s10 = sshll.u32 %s100_s9, 4  ;;  %p53_p0 = scmp.ne.s32.totalorder %s144_s0, %s52_s13  ;;  %s16_s10 = int_to_ptr.vmem [resolvable:$true] %s15_s10 }
   0x3   :  { %p56_p1 = scmp.lt.u32.totalorder %s52_s13, %s144_s0 }
   0x5   :  { %p58_p2 = pnand %p56_p1, %p53_p0 }
   0x7   :  { %61 = shalt.err (!%p58_p2)
}
   0x8   :  { %s62_s18 = scalar_lea.vmem %s16_s10, 64  ;;  %p67_p4 = scmp.lt.s32.totalorder %s16_s10, %s16_s10 }
   0x9   :  { %p63_p3 = scmp.ne.s32.totalorder %s16_s10, %s62_s18  ;;  %p68_p5 = scmp.lt.s32.totalorder %s62_s18, %s62_s18 }
   0xb   :  { %p69_p6 = por %p68_p5, %p67_p4 }
   0xd   :  { %p70_p7 = pnand %p69_p6, %p63_p3 }
   0xf   :  { %73 = shalt.err (!%p70_p7)
}
  0x10   :  { %18 = dma.hbm_to_vmem [thread:$0]  %s144_s0, 64, %s16_s10, [#allocation3]  }
  0x11   :  { %96 = dma.done.wait [#allocation3], 64  }
  0x12   :  { %97 = vsyncadd [#allocation3], 4294967232  ;;  %s101_s21 = smov [#allocation5]   ;;  %v24_v0 = vld [vmem:[#allocation2] sm:$0xf] }
  0x13   :  { %s40_s22 = sshll.u32 %s101_s21, 4  ;;  %v49_v1 = vld [vmem:[%s145_s1] ss:$0 sm:$0xff]  ;;  %s41_s22 = int_to_ptr.vmem [resolvable:$true] %s40_s22 }
  0x14   :  { %v32_v2 = vadd.f32 %v49_v1, %v24_v0  ;;  %s74_s25 = scalar_lea.vmem %s41_s22, 64  ;;  %p79_p9 = scmp.lt.s32.totalorder %s41_s22, %s41_s22 }
  0x15   :  { %p75_p8 = scmp.ne.s32.totalorder %s41_s22, %s74_s25  ;;  %p80_p10 = scmp.lt.s32.totalorder %s74_s25, %s74_s25 }
  0x16   :  { %33 = vst [vmem:[#allocation5] sm:$0xf] %v32_v2 }
  0x17   :  { %p81_p11 = por %p80_p10, %p79_p9 }
  0x19   :  { %p82_p12 = pnand %p81_p11, %p75_p8 }
  0x1b   :  { %85 = shalt.err (!%p82_p12)
}
  0x1c   :  { %s86_s27 = scalar_lea.hbm %s146_s2, 64 }
  0x1d   :  { %p87_p13 = scmp.ne.s32.totalorder %s146_s2, %s86_s27  ;;  %p90_p0 = scmp.lt.u32.totalorder %s86_s27, %s146_s2 }
  0x1f   :  { %p92_p1 = pnand %p90_p0, %p87_p13 }
  0x21   :  { %95 = shalt.err (!%p92_p1)
}
  0x22   :  { %43 = dma.vmem_to_hbm [thread:$0]  %s41_s22, 64, %s146_s2, [#allocation4]  }
  0x23   :  { %98 = dma.done.wait [#allocation4], 64  }
  0x24   :  { %99 = vsyncadd [#allocation4], 4294967232 }
  0x25   :  { %47 = vsyncpa [#allocation3], 1 }
  0x26   :  { %48 = vsyncpa [#allocation4], 1 }

</bundles_post_ra>
